<compile_context>
chip_gen: v6e
topology: v6e:2x2x1
jax: 0.10.0
libtpu: 0.0.40
codegen_flags: <defaults>
</compile_context>

<pallas_src>
import jax
import jax.numpy as jnp
from jax import lax
from jax.experimental import pallas as pl
from jax.experimental.pallas import tpu as pltpu


_PRECISION = lax.Precision.HIGHEST


def _round_up(x, m):
    return ((x + m - 1) // m) * m


def _softmax_att(energy, gamma):
    """gamma * softmax(rowmax(E) - E) computed as gamma * exp(rowmin(E)-E)/sum."""
    e_min = jnp.min(energy, axis=-1, keepdims=True)          # single reduction
    p = jnp.exp(e_min - energy)                               # args <= 0, no overflow
    s = jnp.sum(p, axis=-1, keepdims=True)
    r = pl.reciprocal(s, approx=True)                         # EUP slot
    r = r * (2.0 - s * r)                                     # 1 Newton step -> ~f32
    return p * (gamma * r)                                    # gamma folded into (C,C)


def cam_kernel_fused(gamma_ref, x_ref, o_ref):
    """Whole CAM per grid step on a (Bb, C, HWp) slab."""
    xf = x_ref[...].astype(jnp.float32)                       # (Bb, C, HWp)
    energy = jnp.einsum("bcx,bdx->bcd", xf, xf,
                        preferred_element_type=jnp.float32,
                        precision=_PRECISION)                 # (Bb, C, C) on MXU
    att = _softmax_att(energy, gamma_ref[0])
    out = jnp.einsum("bcd,bdx->bcx", att, xf,
                     preferred_element_type=jnp.float32,
                     precision=_PRECISION)                    # (Bb, C, HWp)
    o_ref[...] = (out + xf).astype(o_ref.dtype)


def cam_kernel_tiled(gamma_ref, x_ref, o_ref, eatt_ref):
    """Two-phase HW-tiled CAM: phase 0 accumulates energy over HW tiles,
    phase 1 streams X again and emits out tiles.  eatt_ref holds energy,
    then (after softmax) the gamma-scaled attention matrix."""
    phase = pl.program_id(1)
    k = pl.program_id(2)
    nk = pl.num_programs(2)
    xf = x_ref[...].astype(jnp.float32)                       # cast per HW tile

    @pl.when((phase == 0) & (k == 0))
    def _():
        eatt_ref[...] = jnp.zeros_like(eatt_ref)

    @pl.when(phase == 0)
    def _():
        eatt_ref[...] += jnp.einsum("bcx,bdx->bcd", xf, xf,
                                    preferred_element_type=jnp.float32,
                                    precision=_PRECISION)

    @pl.when((phase == 0) & (k == nk - 1))
    def _():
        eatt_ref[...] = _softmax_att(eatt_ref[...], gamma_ref[0])

    @pl.when(phase == 1)
    def _():
        out = jnp.einsum("bcd,bdx->bcx", eatt_ref[...], xf,
                         preferred_element_type=jnp.float32,
                         precision=_PRECISION)
        o_ref[...] = (out + xf).astype(o_ref.dtype)


def cam_forward(x, gamma, *, max_batch_block=8, vmem_frac=0.8, force_hw_tile=None):
    """x: (b, C, h, w); gamma: (1,) float32.  Returns gamma*CAM(x) + x."""
    b, C, h, w = x.shape
    hw = h * w
    dtype = x.dtype
    itemsize = jnp.dtype(dtype).itemsize

    hwp = _round_up(hw, 128)                                  # lane-dense stores
    gamma = jnp.asarray(gamma, jnp.float32).reshape(1)

    # Generation-aware VMEM budget (v5e/v6e: 128 MiB, v7x: 64 MiB per TC).
    try:
        vmem_cap = int(pltpu.get_tpu_info().vmem_capacity_bytes)
    except Exception:
        vmem_cap = 64 * 1024 * 1024                           # conservative fallback
    budget = int(vmem_frac * vmem_cap)

    cc_bytes = 4 * C * C * 4                                  # energy/p/att f32 temps

    def fused_bytes(bb):
        blk = bb * C * hwp * itemsize
        f32 = bb * C * hwp * 4
        # 2x double-buffered in + 2x out blocks + f32 copy/out temp + (C,C) temps
        return 4 * blk + 2 * f32 + bb * cc_bytes

    def tiled_bytes(t):
        blk = C * t * itemsize
        f32 = C * t * 4
        return 4 * blk + 2 * f32 + cc_bytes

    use_tiled = (force_hw_tile is not None) or (fused_bytes(1) > budget)

    if not use_tiled:
        # -------- fused path: (Bb, C, HWp) per grid step --------------------
        bb_cap = min(b, max_batch_block, max(1, (b + 1) // 2))   # >=2 steps if b>=2
        Bb = 1
        for cand in range(bb_cap, 0, -1):
            if fused_bytes(cand) <= budget:
                Bb = cand
                break
        nb = pl.cdiv(b, Bb)
        b_pad = nb * Bb

        x_flat = x.reshape(b, C, hw)
        x_flat = jnp.pad(x_flat, ((0, b_pad - b), (0, 0), (0, hwp - hw)))

        out_flat = pl.pallas_call(
            cam_kernel_fused,
            out_shape=jax.ShapeDtypeStruct((b_pad, C, hwp), dtype),
            grid_spec=pltpu.PrefetchScalarGridSpec(
                num_scalar_prefetch=0,
                grid=(nb,),
                in_specs=[
                    pl.BlockSpec(memory_space=pltpu.MemorySpace.SMEM),   # gamma
                    pl.BlockSpec((Bb, C, hwp), lambda i: (i, 0, 0)),     # x batch block
                ],
                out_specs=pl.BlockSpec((Bb, C, hwp), lambda i: (i, 0, 0)),
            ),
            compiler_params=pltpu.CompilerParams(
                dimension_semantics=("parallel",),
                vmem_limit_bytes=budget,
            ),
        )(gamma, x_flat)
    else:
        # -------- tiled path: two-phase grid over HW tiles -------------------
        if force_hw_tile is not None:
            t_hw = _round_up(int(force_hw_tile), 128)
        else:
            t_hw = 128
            for cand in range(hwp, 127, -128):
                if tiled_bytes(cand) <= budget:
                    t_hw = cand
                    break
        t_hw = min(t_hw, hwp)
        hwp2 = _round_up(hwp, t_hw)
        nk = hwp2 // t_hw

        x_flat = x.reshape(b, C, hw)
        x_flat = jnp.pad(x_flat, ((0, 0), (0, 0), (0, hwp2 - hw)))

        out_flat = pl.pallas_call(
            cam_kernel_tiled,
            out_shape=jax.ShapeDtypeStruct((b, C, hwp2), dtype),
            grid_spec=pltpu.PrefetchScalarGridSpec(
                num_scalar_prefetch=0,
                grid=(b, 2, nk),                      # batch x {energy, output} x HW tiles
                in_specs=[
                    pl.BlockSpec(memory_space=pltpu.MemorySpace.SMEM),   # gamma
                    pl.BlockSpec((1, C, t_hw), lambda i, p, k: (i, 0, k)),
                ],
                # Output block stays at tile 0 during the energy phase (never
                # written, no writeback since the index is constant), then
                # walks the tiles during the output phase.
                out_specs=pl.BlockSpec((1, C, t_hw), lambda i, p, k: (i, 0, k * p)),
                scratch_shapes=[pltpu.VMEM((1, C, C), jnp.float32)],
            ),
            compiler_params=pltpu.CompilerParams(
                dimension_semantics=("parallel", "arbitrary", "arbitrary"),
                vmem_limit_bytes=budget,
            ),
        )(gamma, x_flat)

    return out_flat[:b, :, :hw].reshape(b, C, h, w)


def cam_reference(x, gamma):
    """Pure-JAX reference mirroring the PyTorch CAM module (f32 semantics)."""
    b, C, h, w = x.shape
    q = x.reshape(b, C, h * w).astype(jnp.float32)
    energy = jnp.einsum("bcx,bdx->bcd", q, q, precision=lax.Precision.HIGHEST)
    energy_new = jnp.max(energy, axis=-1, keepdims=True) - energy
    att = jax.nn.softmax(energy_new, axis=-1)
    out = jnp.einsum("bcd,bdx->bcx", att, q, precision=lax.Precision.HIGHEST)
    out = out.reshape(b, C, h, w)
    return (gamma.reshape(()) * out + x).astype(x.dtype)


if __name__ == "__main__":
    key = jax.random.PRNGKey(0)
    b, C, h, w = 2, 8, 16, 16
    x = jax.random.normal(key, (b, C, h, w), dtype=jnp.float32)

    # nn.Parameter(torch.zeros(1)) -> deterministic zero init.
    gamma0 = jnp.zeros((1,), dtype=jnp.float32)
    y = cam_forward(x, gamma0)
    jax.block_until_ready(y)
    assert jnp.allclose(y, cam_reference(x, gamma0), atol=1e-4, rtol=1e-4)

    # Exercise the attention path with a nonzero gamma (fused path).
    gamma1 = jnp.array([0.5], dtype=jnp.float32)
    y1 = cam_forward(x, gamma1)
    jax.block_until_ready(y1)
    y1_ref = cam_reference(x, gamma1)
    assert jnp.allclose(y1, y1_ref, atol=1e-4, rtol=1e-4)

    # Exercise the two-phase HW-tiled (large-shape / v7x) path at a small shape.
    y2 = cam_forward(x, gamma1, force_hw_tile=128)
    jax.block_until_ready(y2)
    assert jnp.allclose(y2, y1_ref, atol=1e-4, rtol=1e-4)

    # Exercise batch blocking + non-128-multiple spatial padding.
    x3 = jax.random.normal(jax.random.PRNGKey(1), (3, 8, 10, 10), dtype=jnp.float32)
    y3 = cam_forward(x3, gamma1)
    jax.block_until_ready(y3)
    assert jnp.allclose(y3, cam_reference(x3, gamma1), atol=1e-4, rtol=1e-4)

    print("KERNEL_OK")
</pallas_src>

<mosaic_0001>
module attributes {stable_mosaic.version = 11 : i64} {
  func.func @cam_kernel_fused(%arg0: i32, %arg1: memref<1xf32, #tpu.memory_space<smem>>, %arg2: memref<1x8x256xf32, #tpu.memory_space<vmem>>, %arg3: memref<1x8x256xf32, #tpu.memory_space<vmem>>) attributes {dimension_semantics = [#tpu.dimension_semantics<parallel>], iteration_bounds = array<i64: 2>, scalar_prefetch = 0 : i64, scratch_operands = 0 : i64, tpu.core_type = #tpu.core_type<tc>, window_params = [{transform_indices = @transform_0, window_bounds = array<i64: 1>}, {transform_indices = @transform_1, window_bounds = array<i64: 1, 8, 256>}, {transform_indices = @transform_2, window_bounds = array<i64: 1, 8, 256>}]} {
    %c0 = arith.constant 0 : index
    %c0_0 = arith.constant 0 : index
    %c0_1 = arith.constant 0 : index
    %0 = vector.load %arg2[%c0, %c0_0, %c0_1] : memref<1x8x256xf32, #tpu.memory_space<vmem>>, vector<1x8x256xf32>
    "tpu.trace_start"() <{level = 10 : i32, message = "bcx,bdx->bcd"}> : () -> ()
    %cst = arith.constant dense<0.000000e+00> : vector<1x8x8xf32>
    %1 = tpu.matmul %0, %0, %cst {dimension_numbers = #tpu.dot_dimension_numbers<[2], [2], [1], [1], [0, 0, 0, 1, 1, 1], [0], [0]>, precision = #tpu.contract_precision<fp32>} : vector<1x8x256xf32>, vector<1x8x256xf32>, vector<1x8x8xf32> -> vector<1x8x8xf32>
    "tpu.trace_stop"() : () -> ()
    %c0_2 = arith.constant 0 : index
    %2 = memref.load %arg1[%c0_2] : memref<1xf32, #tpu.memory_space<smem>>
    %cst_3 = arith.constant dense<0x7F800000> : vector<1x8xf32>
    %3 = vector.multi_reduction <minimumf>, %1, %cst_3 [2] : vector<1x8x8xf32> to vector<1x8xf32>
    %4 = vector.shape_cast %3 : vector<1x8xf32> to vector<1x8x1xf32>
    %5 = vector.broadcast %4 : vector<1x8x1xf32> to vector<1x8x8xf32>
    %6 = arith.subf %5, %1 : vector<1x8x8xf32>
    %7 = math.exp %6 : vector<1x8x8xf32>
    %cst_4 = arith.constant dense<0.000000e+00> : vector<1x8xf32>
    %8 = vector.multi_reduction <add>, %7, %cst_4 [2] : vector<1x8x8xf32> to vector<1x8xf32>
    %9 = vector.shape_cast %8 : vector<1x8xf32> to vector<1x8x1xf32>
    %10 = tpu.reciprocal %9 {approx = true} : vector<1x8x1xf32> -> vector<1x8x1xf32>
    %11 = arith.mulf %9, %10 : vector<1x8x1xf32>
    %cst_5 = arith.constant 2.000000e+00 : f32
    %12 = vector.broadcast %cst_5 : f32 to vector<1x8x1xf32>
    %13 = arith.subf %12, %11 : vector<1x8x1xf32>
    %14 = arith.mulf %10, %13 : vector<1x8x1xf32>
    %15 = vector.broadcast %2 : f32 to vector<1x8x1xf32>
    %16 = arith.mulf %15, %14 : vector<1x8x1xf32>
    %17 = vector.broadcast %16 : vector<1x8x1xf32> to vector<1x8x8xf32>
    %18 = arith.mulf %7, %17 : vector<1x8x8xf32>
    "tpu.trace_start"() <{level = 10 : i32, message = "bcd,bdx->bcx"}> : () -> ()
    %cst_6 = arith.constant dense<0.000000e+00> : vector<1x8x256xf32>
    %19 = tpu.matmul %18, %0, %cst_6 {dimension_numbers = #tpu.dot_dimension_numbers<[2], [1], [1], [2], [0, 0, 0, 1, 1, 2], [0], [0]>, precision = #tpu.contract_precision<fp32>} : vector<1x8x8xf32>, vector<1x8x256xf32>, vector<1x8x256xf32> -> vector<1x8x256xf32>
    "tpu.trace_stop"() : () -> ()
    %20 = arith.addf %19, %0 : vector<1x8x256xf32>
    %c0_7 = arith.constant 0 : index
    %c0_8 = arith.constant 0 : index
    %c0_9 = arith.constant 0 : index
    %21 = vector.load %arg3[%c0_7, %c0_8, %c0_9] : memref<1x8x256xf32, #tpu.memory_space<vmem>>, vector<1x8x256xf32>
    tpu.vector_store %arg3[%c0_7, %c0_8, %c0_9], %20 {strides = array<i32>} : memref<1x8x256xf32, #tpu.memory_space<vmem>>, vector<1x8x256xf32>,
    return
  }
  func.func @transform_0(%arg0: i32) -> i32 {
    %c0_i32 = arith.constant 0 : i32
    %c0_i32_0 = arith.constant 0 : i32
    return %c0_i32 : i32
  }
  func.func @transform_1(%arg0: i32) -> (i32, i32, i32) {
    %c0_i32 = arith.constant 0 : i32
    %c0_i32_0 = arith.constant 0 : i32
    %c0_i32_1 = arith.constant 0 : i32
    return %arg0, %c0_i32, %c0_i32_0 : i32, i32, i32
  }
  func.func @transform_2(%arg0: i32) -> (i32, i32, i32) {
    %c0_i32 = arith.constant 0 : i32
    %c0_i32_0 = arith.constant 0 : i32
    %c0_i32_1 = arith.constant 0 : i32
    return %arg0, %c0_i32, %c0_i32_0 : i32, i32, i32
  }
}

</mosaic_0001>

<bundles_post_ra>
// kernel: tpu_custom_call.1
= control target key start
LH: loop header
LB: loop body
LE: loop exit
PB: predicated region body
PF: predicated region fallthrough
CT: control target
= control target key end

     0   :  { %s1591_s0 = inlined_call_operand.<no memory space> [shape: f32[1], index: 0, kind: input, shape index: {}]   ;;  %s1592_s1 = inlined_call_operand.hbm [shape: f32[2,8,256], index: 1, kind: input, shape index: {}]   ;;  %s1593_s2 = inlined_call_operand.hbm [shape: f32[2,8,256], index: 2, kind: output, shape index: {}]  }
   0x1   :  { %7 = sst [smem:[#allocation2]] %s1591_s0 }
   0x2   :  { %8 = vsyncpa [#allocation4], 0 }
   0x3   :  { %10 = vsyncpa [#allocation4 + $0x1], 0 }
   0x4   :  { %11 = vsyncpa [#allocation5], 0 }
   0x5   :  { %13 = vsyncpa [#allocation5 + $0x1], 0  ;;  %s1390_s11 = smov 0   ;;  %s1392_s12 = smov 0  }
   0x6   :  { %s1394_s13 = smov 0   ;;  %s1396_s14 = smov 0  }
   0x7 LB: > { %s1411_s0 = sadd.s32 4294967295, %s1367_s14   ;;  %s1208_s15 = sadd.s32 4294967294, %s1367_s14   ;;  %s1367_s14 = sphi %s1396_s14, %s1610_s14   ;;  %s1363_s13 = sphi %s1394_s13, %s1609_s13   ;;  %s1359_s12 = sphi %s1392_s12, %s1608_s12   ;;  %s1355_s11 = sphi %s1390_s11, %s1607_s11  }
   0x8   : > { %s1415_s16 = sadd.s32 1, %s1367_s14   ;;  %s47_s17 = sadd.s32 1, %s1363_s13 }
   0x9   : > { %s44_s18 = ssub.s32 %s1367_s14, %s1415_s16  ;;  %p54_p0 = scmp.ne.s32.totalorder %s1363_s13, %s1359_s12 }
   0xa   : > { %p45_p1 = scmp.eq.s32.totalorder %s44_s18, 0  ;;  %p55_p2 = scmp.eq.s32.totalorder %s1367_s14, 0 }
   0xb   : > { %p60_p3 = scmp.ne.s32.totalorder %s1359_s12, %s1355_s11  ;;  %p61_p4 = scmp.eq.s32.totalorder %s1411_s0, 0 }
   0xc   : > { %s1427_s19 = scalar_select %p45_p1, %s1363_s13, %s47_s17  }
   0xd   : > { %p1429_p5 = por %p55_p2, %p54_p0  ;;  %p1433_p6 = por %p61_p4, %p60_p3 }
   0xe   : > { %p84_p7 = scmp.eq.s32.totalorder %s1411_s0, 1  ;;  %p90_p8 = scmp.eq.s32.totalorder %s1208_s15, 1 }
   0xf   : > { %s1597_s21 = scalar_select %p1433_p6, 1, 0 }
  0x10   : > { %p1236_p10 = scmp.lt.s32.totalorder %s1367_s14, 2  ;;  %p1440_p11 = por %p84_p7, %p54_p0 }
  0x11   : > { %p1444_p12 = por %p90_p8, %p60_p3  ;;  %s113_s24 = sand.u32 1, %s1363_s13  }
  0x12   : > { %s1598_s22 = scalar_select %p1440_p11, 1, 0 }
  0x13   : > { %s1599_s23 = scalar_select %p1444_p12, 1, 0 }
  0x14   : > { %s1222_s25 = sshll.u32 %s1367_s14, 8  ;;  %s1211_s26 = sshll.u32 %s113_s24, 4 }
  0x15   : > { %s1453_s29 = scalar_lea.hbm %s1592_s1, %s1222_s25  ;;  %s117_s30 = scalar_lea.vmem [#allocation3], %s1211_s26 }
  0x16   : > { %s125_s3 = sshll.u32 %s117_s30, 4  ;;  %p1457_p13 = pnand %p1236_p10, %p1429_p5  ;;  %s1461_s3 = int_to_ptr.vmem [resolvable:$true] %s125_s3 }
  0x17   : > { %s114_s5 = scalar_lea.sflag [#allocation4], %s113_s24  ;;  %s1275_s6 = scalar_lea.hbm %s1453_s29, 256 }
  0x18   : > { %p1276_p2 = scmp.ne.s32.totalorder %s1453_s29, %s1275_s6  ;;  %p1277_p3 = pneg %p1457_p13 }
  0x19   : > { %s1280_s9 = scalar_lea.hbm %s1592_s1, 512  ;;  %p1281_p5 = scmp.lt.s32.totalorder %s1453_s29, %s1592_s1 }
  0x1a   : > { %p1278_p4 = pnand %p1277_p3, %p1276_p2  ;;  %p1282_p8 = scmp.lt.s32.totalorder %s1280_s9, %s1275_s6 }
  0x1c   : > { %p1279_p7 = pneg %p1278_p4  ;;  %p1283_p10 = por %p1282_p8, %p1281_p5 }
  0x1e   : > { %p1284_p9 = pnand %p1283_p10, %p1279_p7 }
  0x20   : > { %1287 = shalt.err (!%p1284_p9)
}
  0x21   : > { %s1288_s17 = scalar_lea.vmem %s1461_s3, 256  ;;  %s1369_s18 = smov [#allocation3]  }
  0x22   : > { %p1289_p0 = scmp.ne.s32.totalorder %s1461_s3, %s1288_s17  ;;  %s1293_s20 = sshll.u32 %s1369_s18, 4  ;;  %s1294_s20 = int_to_ptr.vmem [resolvable:$false] %s1293_s20 }
  0x23   : > { %s1295_s24 = scalar_lea.vmem %s1294_s20, 512  ;;  %p1296_p4 = scmp.lt.s32.totalorder %s1461_s3, %s1294_s20 }
  0x24   : > { %p1291_p1 = pnand %p1289_p0, %p1277_p3  ;;  %p1297_p12 = scmp.lt.s32.totalorder %s1295_s24, %s1288_s17 }
  0x26   : > { %p1292_p2 = pneg %p1291_p1  ;;  %p1298_p11 = por %p1297_p12, %p1296_p4 }
  0x28   : > { %p1299_p6 = pnand %p1298_p11, %p1292_p2 }
  0x2a   : > { %1302 = shalt.err (!%p1299_p6)
}
  0x2b   : > { %1231 = dma.hbm_to_vmem [thread:$0]  (!%p1457_p13), %s1453_s29, 256, %s1461_s3, %s114_s5  }
  0x2c   : > { %p1601_p9 = scmp.lt.s32.totalorder %s1367_s14, 3  ;;  %p1602_p7 = scmp.ge.s32.totalorder %s1367_s14, 1 }
  0x2e   : > { %p131_p0 = pnand %p1602_p7, %p1601_p9 }
  0x2f   : > { %s1488_s25 = sand.u32 (!%p131_p0), 1, %s1359_s12   ;;  %p1603_p6 = scmp.ne.s32.totalorder (!%p131_p0), %s1597_s21, 0 }
  0x30   : > { %134 = sbr.rel (%p131_p0) target bundleno = 823 (0x337), region = 28  ;;  %s1215_s26 = sshll.u32 (!%p131_p0), %s1488_s25, 4 }
  0x31   : > { %s137_s27 = scalar_lea.sflag (!%p131_p0), [#allocation4], %s1488_s25  ;;  %s140_s28 = scalar_lea.vmem (!%p131_p0), [#allocation3], %s1215_s26 }
  0x35   : > { %1346 = dma.done.wait (%p1603_p6), %s137_s27, 256  }
  0x36   : > { %1348 = vsyncadd (%p1603_p6), %s137_s27, 4294967040  ;;  %v1498_v0 = vld [vmem:[%s140_s28 + $0x8] sm:$0xff]  ;;  %v1500_v1 = vld [vmem:[%s140_s28] sm:$0xff]  ;;  %vm636_vm0 = vcmask 64512   ;;  %v1370_v35 = vmov 0.0   ;;  %s635_s21 = sld [smem:[#allocation2]] }
  0x37   : > { %v1503_v2 = vand.u32 4294901760, %v1498_v0  ;;  %v1506_v3 = vand.u32 4294901760, %v1500_v1  ;;  %s1223_s29 = sshll.u32 %s1411_s0, 8  ;;  %s160_s30 = scalar_lea.vmem [#allocation6], %s1215_s26 }
  0x38   : > { %s1138_s3 = sshll.u32 %s160_s30, 4  ;;  %s1136_s6 = scalar_lea.hbm %s1593_s2, %s1223_s29  ;;  %s1139_s3 = int_to_ptr.vmem [resolvable:$true] %s1138_s3 }
  0x39   : > { %194 = vmatprep.subr.mxu0 %v1503_v2  ;;  %v230_v4 = vsub.f32 %v1498_v0, %v1503_v2  ;;  %v1513_v5 = vsub.f32 %v1500_v1, %v1506_v3  ;;  %320 = vmatprep.mubr.f32.mxu1 %v1503_v2  ;;  %s1124_s7 = scalar_lea.sflag [#allocation5], %s1488_s25  ;;  %s1303_s8 = scalar_lea.vmem %s1139_s3, 256 }
  0x3a   : > { %196 = vmatpush1.xpose.msra.mxu0 %v1506_v3  ;;  %p1304_p11 = scmp.ne.s32.totalorder %s1139_s3, %s1303_s8  ;;  %p1604_p12 = scmp.ne.s32.totalorder %s1598_s22, 0 }
  0x3b   : > { %v1517_v6 = vand.u32 4294901760, %v230_v4  ;;  %v1520_v7 = vand.u32 4294901760, %v1513_v5  ;;  %359 = vmatprep.subr.mxu0 %v230_v4  ;;  %s1371_s0 = smov [#allocation6]  }
  0x3c   : > { %v650_v40 = vstv %s635_s21  ;;  %p1305_p13 = pnand %p1304_p11, %p1604_p12  ;;  %s1307_s9 = sshll.u32 %s1371_s0, 4  ;;  %s1308_s9 = int_to_ptr.vmem [resolvable:$false] %s1307_s9 }
  0x3d   : > { %v232_v8 = vsub.f32 %v230_v4, %v1517_v6  ;;  %v238_v9 = vsub.f32 %v1513_v5, %v1520_v7  ;;  %s1309_s10 = scalar_lea.vmem %s1308_s9, 512  ;;  %p1310_p3 = scmp.lt.s32.totalorder %s1139_s3, %s1308_s9 }
  0x3e   : > { %p1306_p1 = pneg %p1305_p13  ;;  %p1311_p5 = scmp.lt.s32.totalorder %s1309_s10, %s1303_s8 }
  0x3f   : > { %v233_v10 = vand.u32 4294901760, %v232_v8  ;;  %v239_v11 = vand.u32 4294901760, %v238_v9 }
  0x40   : > { %p1312_p8 = por %p1311_p5, %p1310_p3 }
  0x41   : > { %234 = vmatprep.mubr.f32.mxu0 %v233_v10  ;;  %280 = vmatprep.subr.mxu1 %v233_v10 }
  0x42   : > { %240 = vmatmul.mubr.f32.vlgmr.msra.gmra.mxu0 %v239_v11  ;;  %286 = vmatpush1.xpose.msra.mxu1 %v239_v11  ;;  %p1313_p10 = pnand %p1312_p8, %p1306_p1 }
  0x43   : > { %362 = vmatpush1.xpose.msra.mxu0 %v1513_v5  ;;  %397 = vmatprep.mubr.f32.mxu0 %v230_v4 }
  0x44   : > { %436 = vmatprep.subr.mxu1 %v1503_v2  ;;  %516 = vmatprep.subr.mxu0 %v1517_v6 }
  0x45   : > { %322 = vmatmul.mubr.f32.vlgmr.msra.gmra.mxu1 %v1506_v3 }
  0x46   : > { %400 = vmatmul.mubr.f32.vlgmr.msra.gmra.mxu0 %v1513_v5  ;;  %438 = vmatpush1.xpose.msra.mxu1 %v1506_v3 }
  0x47   : > { %520 = vmatpush1.xpose.msra.mxu0 %v1520_v7  ;;  %474 = vmatprep.mubr.f32.mxu1 %v1517_v6 }
  0x48   : > { %554 = vmatprep.mubr.f32.mxu0 %v1503_v2  ;;  %592 = vmatprep.subr.mxu1 %v1503_v2 }
  0x49   : > { %478 = vmatmul.mubr.f32.vlgmr.msra.gmra.mxu1 %v1520_v7  ;;  %687 = vmatprep.subr.mxu0 %v1503_v2 }
  0x4a   : > { %556 = vmatmul.mubr.f32.vlgmr.msra.gmra.mxu0 %v1506_v3  ;;  %594 = vmatpush1.xpose.msra.mxu1 %v1506_v3 }
  0x4b   : > { %628 = vmatprep.mubr.f32.mxu1 %v1503_v2  ;;  %769 = vmatprep.subr.mxu1 %v233_v10 }
  0x4c   : > { %689 = vmatpush1.msra.mxu0 %v1506_v3  ;;  %722 = vmatprep.mubr.f32.mxu0 %v1370_v35 }
  0x4d   : > { %630 = vmatmul.mubr.f32.vlgmr.msra.gmra.mxu1 %v1506_v3  ;;  %848 = vmatprep.subr.mxu0 %v230_v4 }
  0x4e   : > { %775 = vmatpush1.msra.mxu1 %v239_v11  ;;  %808 = vmatprep.mubr.f32.mxu1 %v1370_v35 }
  0x4f   : > { %924 = vmatprep.subr.mxu1 %v1503_v2 }
 0x102   : > { %v241_v12 = vpop.f32.mrf.mxu0 }
 0x104   : > { %v243_v13 = vpop.f32.mrf.mxu0 }
 0x105   : > { %v323_v14 = vpop.f32.mrf.mxu1 }
 0x106   : > { %v324_v15 = vadd.f32 %v323_v14, %v241_v12  ;;  %v401_v16 = vpop.f32.mrf.mxu0 }
 0x107   : > { %v325_v17 = vpop.f32.mrf.mxu1 }
 0x108   : > { %v402_v18 = vadd.f32 %v401_v16, %v324_v15  ;;  %v403_v19 = vpop.f32.mrf.mxu0 }
 0x109   : > { %v479_v20 = vpop.f32.mrf.mxu1 }
 0x10a   : > { %v480_v21 = vadd.f32 %v479_v20, %v402_v18  ;;  %v557_v22 = vpop.f32.mrf.mxu0 }
 0x10b   : > { %v481_v23 = vpop.f32.mrf.mxu1 }
 0x10c   : > { %v558_v24 = vadd.f32 %v557_v22, %v480_v21  ;;  %v559_v25 = vpop.f32.mrf.mxu0 }
 0x10d   : > { %v631_v26 = vpop.f32.mrf.mxu1 }
 0x10e   : > { %v632_v27 = vadd.f32 %v631_v26, %v558_v24 }
 0x10f   : > { %v633_v28 = vpop.f32.mrf.mxu1 }
 0x110   : > { %v637_v29 = vsel %vm636_vm0, %v632_v27, inf }
 0x111   : > { %638 = vmin.xlane.f32.xlu0 %v637_v29 }
 0x19a   : > { %v639_v30 = vpop.xlane.xlu0 %638 }
 0x19b   : > { %v640_v31 = vsub.f32 %v639_v30, %v632_v27 }
 0x19d   : > { %v641_v32 = vmul.f32 1.442695, %v640_v31 }
 0x19f   : > { %1271 = vpow2.f32 %v641_v32 }
 0x1ac   : > { %v1272_v33 = vpop.eup %1271 }
 0x1ad   : > { %v643_v34 = vsel %vm636_vm0, %v1272_v33, 0.0 }
 0x1ae   : > { %644 = vadd.xlane.f32.xlu0 %v643_v34 }
 0x237   : > { %v645_v36 = vpop.xlane.xlu0 %644 }
 0x238   : > { %1273 = vrcp.f32 %v645_v36 }
 0x245   : > { %v1274_v37 = vpop.eup %1273 }
 0x246   : > { %v647_v38 = vmul.f32 %v1274_v37, %v645_v36 }
 0x248   : > { %v648_v39 = vsub.f32 2.0, %v647_v38 }
 0x24a   : > { %v649_v41 = vmul.f32 %v1274_v37, %v648_v39 }
 0x24c   : > { %v651_v42 = vmul.f32 %v650_v40, %v649_v41 }
 0x24e   : > { %v652_v43 = vmul.f32 %v1272_v33, %v651_v42 }
 0x250   : > { %v654_v44 = vsel %vm636_vm0, %v652_v43, 0 }
 0x251   : > { %v723_v45 = vand.u32 4294901760, %v654_v44 }
 0x253   : > { %v724_v46 = vsub.f32 %v654_v44, %v723_v45  ;;  %810 = vmatmul.mubr.f32.vlgmr.msra.gmra.mxu1 %v723_v45 }
 0x254   : > { %926 = vmatpush1.msra.mxu1 %v1506_v3  ;;  %959 = vmatprep.mubr.f32.mxu1 %v1370_v35 }
 0x255   : > { %v725_v47 = vand.u32 4294901760, %v724_v46  ;;  %1078 = vmatprep.subr.mxu1 %v1503_v2 }
 0x257   : > { %963 = vmatmul.mubr.f32.vlgmr.msra.gmra.mxu1 %v725_v47  ;;  %v726_v48 = vsub.f32 %v724_v46, %v725_v47 }
 0x258   : > { %1080 = vmatpush1.msra.mxu1 %v1506_v3  ;;  %1113 = vmatprep.mubr.f32.mxu1 %v1370_v35 }
 0x259   : > { %v727_v49 = vand.u32 4294901760, %v726_v48 }
 0x25b   : > { %728 = vmatmul.mubr.f32.vlgmr.msra.gmra.mxu0 %v727_v49  ;;  %1115 = vmatmul.mubr.f32.vlgmr.msra.gmra.mxu1 %v723_v45 }
 0x25c   : > { %851 = vmatpush1.msra.mxu0 %v1513_v5  ;;  %884 = vmatprep.mubr.f32.mxu0 %v1370_v35 }
 0x25d   : > { %1002 = vmatprep.subr.mxu0 %v1517_v6 }
 0x25f   : > { %887 = vmatmul.mubr.f32.vlgmr.msra.gmra.mxu0 %v724_v46 }
 0x260   : > { %1006 = vmatpush1.msra.mxu0 %v1520_v7  ;;  %1039 = vmatprep.mubr.f32.mxu0 %v1370_v35 }
 0x263   : > { %1041 = vmatmul.mubr.f32.vlgmr.msra.gmra.mxu0 %v723_v45 }
 0x313   : > { %v811_v50 = vpop.f32.mrf.mxu1 }
 0x315   : > { %v813_v51 = vpop.f32.mrf.mxu1 }
 0x317   : > { %v964_v52 = vpop.f32.mrf.mxu1 }
 0x319   : > { %v966_v58 = vpop.f32.mrf.mxu1 }
 0x31b   : > { %v729_v53 = vpop.f32.mrf.mxu0  ;;  %v1116_v3 = vpop.f32.mrf.mxu1 }
 0x31c   : > { %v730_v54 = vadd.f32 %v729_v53, %v1500_v1 }
 0x31d   : > { %v731_v55 = vpop.f32.mrf.mxu0  ;;  %v1118_v8 = vpop.f32.mrf.mxu1 }
 0x31e   : > { %v732_v56 = vadd.f32 %v731_v55, %v1498_v0  ;;  %v812_v57 = vadd.f32 %v811_v50, %v730_v54 }
 0x31f   : > { %v888_v59 = vpop.f32.mrf.mxu0 }
 0x320   : > { %v889_v60 = vadd.f32 %v888_v59, %v812_v57  ;;  %v814_v61 = vadd.f32 %v813_v51, %v732_v56 }
 0x321   : > { %v890_v62 = vpop.f32.mrf.mxu0 }
 0x322   : > { %v891_v63 = vadd.f32 %v890_v62, %v814_v61  ;;  %v965_v2 = vadd.f32 %v964_v52, %v889_v60 }
 0x323   : > { %v1042_v4 = vpop.f32.mrf.mxu0 }
 0x324   : > { %v1043_v5 = vadd.f32 %v1042_v4, %v965_v2  ;;  %v967_v6 = vadd.f32 %v966_v58, %v891_v63 }
 0x325   : > { %v1044_v1 = vpop.f32.mrf.mxu0 }
 0x326   : > { %v1117_v0 = vadd.f32 %v1116_v3, %v1043_v5  ;;  %v1045_v7 = vadd.f32 %v1044_v1, %v967_v6 }
 0x328   : > { %1121 = vst [vmem:[%s160_s30] sm:$0xff] %v1117_v0  ;;  %v1119_v9 = vadd.f32 %v1118_v8, %v1045_v7 }
 0x32a   : > { %1122 = vst [vmem:[%s160_s30 + $0x8] sm:$0xff] %v1119_v9 }
 0x32b   : > { %1316 = shalt.err (!%p1313_p10)
}
 0x32c   : > { %s1317_s15 = scalar_lea.hbm %s1136_s6, 256  ;;  %s1321_s20 = scalar_lea.hbm %s1593_s2, 512 }
 0x32d   : > { %p1318_p2 = scmp.ne.s32.totalorder %s1136_s6, %s1317_s15  ;;  %p1322_p7 = scmp.lt.s32.totalorder %s1136_s6, %s1593_s2 }
 0x32e   : > { %p1323_p0 = scmp.lt.s32.totalorder %s1321_s20, %s1317_s15 }
 0x32f   : > { %p1319_p4 = pnand %p1318_p2, %p1604_p12 }
 0x330   : > { %p1324_p6 = por %p1323_p0, %p1322_p7 }
 0x331   : > { %p1320_p9 = pneg %p1319_p4 }
 0x333   : > { %p1325_p11 = pnand %p1324_p6, %p1320_p9 }
 0x335   : > { %1328 = shalt.err (!%p1325_p11)
}
 0x336   : > { %1226 = dma.vmem_to_hbm [thread:$0]  (%p1604_p12), %s1139_s3, 256, %s1136_s6, %s1124_s7  }
 0x337 PF: > { %s1150_s26 = sand.u32 1, %s1355_s11   ;;  %p1605_p13 = scmp.ne.s32.totalorder %s1599_s23, 0 }
 0x338   : > { %p1606_p1 = scmp.ge.s32.totalorder %s1367_s14, 2  ;;  %s1151_s27 = scalar_lea.sflag [#allocation5], %s1150_s26 }
 0x33a   : > { %p1233_p3 = pnand %p1606_p1, %p1605_p13 }
 0x33c   : > { %p1234_p5 = pneg %p1233_p3 }
 0x33e   : > { %1350 = dma.done.wait (%p1234_p5), %s1151_s27, 256  }
 0x33f   : > { %1352 = vsyncadd (%p1234_p5), %s1151_s27, 4294967040  ;;  %p16_p8 = scmp.ge.s32.totalorder %s1415_s16, 4   ;;  %s1607_s11 = smov %s1359_s12 }
 0x340   : > { %s1608_s12 = smov %s1363_s13  ;;  %s1609_s13 = smov %s1427_s19 }
 0x341   : > { %s1610_s14 = smov %s1415_s16  ;;  %18 = sbr.rel (!%p16_p8) target bundleno = 7 (0x7), region = 73 }
 0x346   :  { %1156 = vsyncpa [#allocation4], 1 }
 0x347   :  { %1158 = vsyncpa [#allocation4 + $0x1], 1 }
 0x348   :  { %1159 = vsyncpa [#allocation5], 1 }
 0x349   :  { %1161 = vsyncpa [#allocation5 + $0x1], 1 }

</bundles_post_ra>
